<compile_context>
chip_gen: v7x
topology: tpu7x:2x2x1
jax: 0.10.0
libtpu: 0.0.40
codegen_flags: <defaults>
</compile_context>

<pallas_src>
import functools

import jax
import jax.numpy as jnp
from jax import lax
from jax.experimental import pallas as pl
from jax.experimental.pallas import tpu as pltpu

EPS = 1e-5


def _round_up(n, m):
    return (n + m - 1) // m * m


def _vmem_capacity_bytes():
    try:
        info = pltpu.get_tpu_info()
        return int(getattr(info, "vmem_capacity_bytes", 64 << 20))
    except Exception:
        return 64 << 20


def _predictor_kernel(H, O, x_ref, w1_ref, w2_ref, w3_ref, rows_ref,
                      logits_ref, rep_ref=None):
    """rows_ref rows: 0=b1' 1=b2' 2=scale3 3=shift3 4=b3 (zero-padded to (8,P))."""
    f32 = jnp.float32
    wdt = w1_ref.dtype

    # In-kernel activation cast: x is read from HBM once as f32 (no host pre-pass).
    x = x_ref[...].astype(wdt)

    # fc1 with bn1 pre-folded, + ReLU (f32 accumulation / elementwise)
    h = jnp.dot(x, w1_ref[...], preferred_element_type=f32)
    h = jnp.maximum(h + rows_ref[0:1, :H], 0.0)

    # fc2 with bn2 pre-folded (dropout == identity in eval), + ReLU
    r = jnp.dot(h.astype(wdt), w2_ref[...], preferred_element_type=f32)
    r = jnp.maximum(r + rows_ref[1:2, :H], 0.0)

    # bn3 as a single FMA (dropout == identity in eval)
    rep = r * rows_ref[2:3, :H] + rows_ref[3:4, :H]

    # fc3
    logits_ref[...] = (
        jnp.dot(rep.astype(wdt), w3_ref[...], preferred_element_type=f32)
        + rows_ref[4:5, :O]
    ).astype(logits_ref.dtype)

    if rep_ref is not None:
        rep_ref[...] = rep.astype(rep_ref.dtype)


def prepare_params(params, *, compute_dtype=jnp.bfloat16):
    """Fold BatchNorm into the Linear layers, transpose / cast weights and pack
    all 1-D parameters into one (8, P) operand.  Call once per parameter set."""
    f32 = jnp.float32
    W1, fb1 = params["fc1_w"].astype(f32), params["fc1_b"].astype(f32)
    W2, fb2 = params["fc2_w"].astype(f32), params["fc2_b"].astype(f32)
    W3, fb3 = params["fc3_w"].astype(f32), params["fc3_b"].astype(f32)
    H, F = W1.shape
    O = W3.shape[0]

    s1 = params["bn1_g"].astype(f32) * lax.rsqrt(params["bn1_v"].astype(f32) + EPS)
    t1 = params["bn1_b"].astype(f32) - params["bn1_m"].astype(f32) * s1
    s2 = params["bn2_g"].astype(f32) * lax.rsqrt(params["bn2_v"].astype(f32) + EPS)
    t2 = params["bn2_b"].astype(f32) - params["bn2_m"].astype(f32) * s2
    s3 = params["bn3_g"].astype(f32) * lax.rsqrt(params["bn3_v"].astype(f32) + EPS)
    t3 = params["bn3_b"].astype(f32) - params["bn3_m"].astype(f32) * s3

    # fc(bn(x)) = x @ (diag(s) @ W^T) + (W @ t + b)
    w1 = (s1[:, None] * W1.T).astype(compute_dtype)      # (F, H)
    b1 = fb1 + W1 @ t1                                   # (H,)
    w2 = (s2[:, None] * W2.T).astype(compute_dtype)      # (H, H)
    b2 = fb2 + W2 @ t2                                   # (H,)
    w3 = W3.T.astype(compute_dtype)                      # (H, O)

    P = _round_up(max(H, O), 128)
    rows = jnp.zeros((8, P), f32)
    rows = rows.at[0, :H].set(b1)
    rows = rows.at[1, :H].set(b2)
    rows = rows.at[2, :H].set(s3)
    rows = rows.at[3, :H].set(t3)
    rows = rows.at[4, :O].set(fb3)

    return {"w1": w1, "w2": w2, "w3": w3, "rows": rows,
            "F": F, "H": H, "O": O, "compute_dtype": compute_dtype}


def custom_predictor_forward(x, params, *, compute_dtype=jnp.bfloat16,
                             block_m=None, return_representation=True,
                             rep_dtype=jnp.float32):
    """x: (N, input_dim) float32.  `params` is either the raw parameter dict or
    the result of prepare_params() (preferred for repeated calls).

    Returns (logits, rep) if return_representation else logits, matching the
    eval-mode CustomPredictor forward."""
    prep = params if "rows" in params else prepare_params(
        params, compute_dtype=compute_dtype)
    w1, w2, w3, rows = prep["w1"], prep["w2"], prep["w3"], prep["rows"]
    F, H, O = prep["F"], prep["H"], prep["O"]

    x = jnp.asarray(x, jnp.float32)
    N = x.shape[0]
    assert x.shape[1] == F

    # ---- generation-aware tile / VMEM sizing ----
    vmem_cap = _vmem_capacity_bytes()
    vmem_budget = (vmem_cap * 3) // 4                 # leave headroom for scratch
    if block_m is None:
        block_m = 512 if vmem_cap <= (64 << 20) else 1024
    tm = max(8, min(_round_up(block_m, 16), _round_up(N, 8)))

    w_bytes = (w1.size * w1.dtype.itemsize + w2.size * w2.dtype.itemsize
               + w3.size * w3.dtype.itemsize + rows.size * 4)

    def _est(tm_):
        io = tm_ * F * 4 + tm_ * O * 4
        if return_representation:
            io += tm_ * H * jnp.dtype(rep_dtype).itemsize
        # upper bound: double-buffer everything + slack for Mosaic scratch
        return 2 * w_bytes + 2 * io + (2 << 20)

    while _est(tm) > vmem_budget and tm > 16:
        tm = max(16, _round_up(tm // 2, 8))
    vmem_limit = int(min(max(_est(tm), 8 << 20), vmem_budget))
    grid = (pl.cdiv(N, tm),)

    flops = 2 * N * (F * H + H * H + H * O) + 6 * N * H
    bytes_accessed = (x.size * 4 + w_bytes + N * O * 4
                      + (N * H * jnp.dtype(rep_dtype).itemsize
                         if return_representation else 0))

    kernel = functools.partial(_predictor_kernel, H, O)
    x_spec = pl.BlockSpec((tm, F), lambda i: (i, 0))       # only x is batch-tiled
    out_specs = [pl.BlockSpec((tm, O), lambda i: (i, 0))]
    out_shape = [jax.ShapeDtypeStruct((N, O), jnp.float32)]
    if return_representation:
        out_specs.append(pl.BlockSpec((tm, H), lambda i: (i, 0)))
        out_shape.append(jax.ShapeDtypeStruct((N, H), rep_dtype))

    def _const_spec(shape, single_buffer):
        idx = lambda i: (0, 0)
        if single_buffer and hasattr(pl, "Buffered"):
            try:   # block-invariant operand: no need for double buffering
                return pl.BlockSpec(shape, idx, pipeline_mode=pl.Buffered(1))
            except Exception:
                pass
        return pl.BlockSpec(shape, idx)

    def _run(single_buffer_weights):
        in_specs = [
            x_spec,
            _const_spec(w1.shape, single_buffer_weights),
            _const_spec(w2.shape, single_buffer_weights),
            _const_spec(w3.shape, single_buffer_weights),
            _const_spec(rows.shape, single_buffer_weights),
        ]
        return pl.pallas_call(
            kernel,
            grid=grid,
            in_specs=in_specs,
            out_specs=tuple(out_specs),
            out_shape=tuple(out_shape),
            compiler_params=pltpu.CompilerParams(
                dimension_semantics=("parallel",),
                vmem_limit_bytes=vmem_limit),
            cost_estimate=pl.CostEstimate(
                flops=int(flops), transcendentals=0,
                bytes_accessed=int(bytes_accessed)),
        )(x, w1, w2, w3, rows)

    try:
        outs = _run(True)
    except Exception:
        # Installed Pallas rejected pipeline_mode=Buffered(1): use default buffering.
        outs = _run(False)

    if return_representation:
        logits, rep = outs
        return logits, rep
    (logits,) = outs
    return logits


def init_params(key, input_dim, hidden_dim, output_dim):
    ks = jax.random.split(key, 12)
    p = {}
    # Linear layers: weight shape (out, in) like nn.Linear
    p["fc1_w"] = 0.1 * jax.random.normal(ks[0], (hidden_dim, input_dim), jnp.float32)
    p["fc1_b"] = 0.05 * jax.random.normal(ks[1], (hidden_dim,), jnp.float32)
    p["fc2_w"] = 0.1 * jax.random.normal(ks[2], (hidden_dim, hidden_dim), jnp.float32)
    p["fc2_b"] = 0.05 * jax.random.normal(ks[3], (hidden_dim,), jnp.float32)
    p["fc3_w"] = 0.1 * jax.random.normal(ks[4], (output_dim, hidden_dim), jnp.float32)
    p["fc3_b"] = 0.05 * jax.random.normal(ks[5], (output_dim,), jnp.float32)
    # BatchNorm1d parameters + running stats (deterministic, non-trivial)
    p["bn1_g"] = 1.0 + 0.1 * jax.random.normal(ks[6], (input_dim,), jnp.float32)
    p["bn1_b"] = 0.1 * jax.random.normal(ks[7], (input_dim,), jnp.float32)
    p["bn1_m"] = 0.1 * jax.random.normal(ks[8], (input_dim,), jnp.float32)
    p["bn1_v"] = 1.0 + 0.1 * jnp.abs(jax.random.normal(ks[9], (input_dim,), jnp.float32))
    p["bn2_g"] = jnp.ones((hidden_dim,), jnp.float32) * 1.05
    p["bn2_b"] = jnp.full((hidden_dim,), 0.02, jnp.float32)
    p["bn2_m"] = jnp.full((hidden_dim,), 0.01, jnp.float32)
    p["bn2_v"] = jnp.ones((hidden_dim,), jnp.float32) * 0.9
    p["bn3_g"] = 1.0 + 0.1 * jax.random.normal(ks[10], (hidden_dim,), jnp.float32)
    p["bn3_b"] = 0.1 * jax.random.normal(ks[11], (hidden_dim,), jnp.float32)
    p["bn3_m"] = jnp.full((hidden_dim,), -0.02, jnp.float32)
    p["bn3_v"] = jnp.ones((hidden_dim,), jnp.float32) * 1.1
    return p


def reference_forward(x, p):
    def bn(v, g, b, m, var):
        return (v - m) * lax.rsqrt(var + EPS) * g + b
    h = bn(x, p["bn1_g"], p["bn1_b"], p["bn1_m"], p["bn1_v"])
    h = jnp.maximum(h @ p["fc1_w"].T + p["fc1_b"], 0.0)
    h = bn(h, p["bn2_g"], p["bn2_b"], p["bn2_m"], p["bn2_v"])
    rep = jnp.maximum(h @ p["fc2_w"].T + p["fc2_b"], 0.0)
    rep = bn(rep, p["bn3_g"], p["bn3_b"], p["bn3_m"], p["bn3_v"])
    logits = rep @ p["fc3_w"].T + p["fc3_b"]
    return logits, rep


if __name__ == "__main__":
    key = jax.random.PRNGKey(0)
    k_x, k_p, k_x2 = jax.random.split(key, 3)

    batch, input_dim, hidden_dim, output_dim = 8, 32, 32, 8
    x = jax.random.normal(k_x, (batch, input_dim), jnp.float32)
    params = init_params(k_p, input_dim, hidden_dim, output_dim)
    ref_logits, ref_rep = reference_forward(x, params)

    # BN folding / weight prep hoisted out of the per-call forward (done once).
    prep_f32 = prepare_params(params, compute_dtype=jnp.float32)
    prep_bf16 = prepare_params(params, compute_dtype=jnp.bfloat16)

    # 1) f32 matmul path: tight check against the unfused reference.
    logits, rep = custom_predictor_forward(x, prep_f32)
    jax.block_until_ready((logits, rep))
    assert logits.shape == (batch, output_dim)
    assert rep.shape == (batch, hidden_dim)
    assert jnp.allclose(logits, ref_logits, atol=5e-4, rtol=5e-4)
    assert jnp.allclose(rep, ref_rep, atol=5e-4, rtol=5e-4)

    # 2) bf16 matmul path (MXU-native on all generations), looser tolerance.
    logits_bf, rep_bf = custom_predictor_forward(x, prep_bf16)
    jax.block_until_ready((logits_bf, rep_bf))
    assert jnp.allclose(logits_bf, ref_logits, atol=5e-2, rtol=5e-2)
    assert jnp.allclose(rep_bf, ref_rep, atol=5e-2, rtol=5e-2)

    # 3) Multi-block ragged batch: grid > 1, unpadded N, Pallas masks the edge block.
    n2 = 300
    x2 = jax.random.normal(k_x2, (n2, input_dim), jnp.float32)
    ref_l2, ref_r2 = reference_forward(x2, params)
    l2, r2 = custom_predictor_forward(x2, prep_f32, block_m=128)
    jax.block_until_ready((l2, r2))
    assert l2.shape == (n2, output_dim) and r2.shape == (n2, hidden_dim)
    assert jnp.allclose(l2, ref_l2, atol=5e-4, rtol=5e-4)
    assert jnp.allclose(r2, ref_r2, atol=5e-4, rtol=5e-4)

    # 4) Logits-only path (return_representation=False) skips the rep writeback;
    #    also exercises the raw-params (un-prepared) entry point.
    l_only = custom_predictor_forward(x2, params, compute_dtype=jnp.float32,
                                      block_m=128, return_representation=False)
    jax.block_until_ready(l_only)
    assert l_only.shape == (n2, output_dim)
    assert jnp.allclose(l_only, ref_l2, atol=5e-4, rtol=5e-4)

    print("KERNEL_OK")
</pallas_src>

<mosaic_0001>
module attributes {stable_mosaic.version = 11 : i64} {
  func.func @_predictor_kernel(%arg0: i32, %arg1: memref<8x32xf32, #tpu.memory_space<vmem>>, %arg2: memref<32x32xf32, #tpu.memory_space<vmem>>, %arg3: memref<32x32xf32, #tpu.memory_space<vmem>>, %arg4: memref<32x8xf32, #tpu.memory_space<vmem>>, %arg5: memref<8x128xf32, #tpu.memory_space<vmem>>, %arg6: memref<8x8xf32, #tpu.memory_space<vmem>>, %arg7: memref<8x32xf32, #tpu.memory_space<vmem>>) attributes {dimension_semantics = [#tpu.dimension_semantics<parallel>], iteration_bounds = array<i64: 1>, scalar_prefetch = 0 : i64, scratch_operands = 0 : i64, tpu.core_type = #tpu.core_type<tc>, window_params = [{transform_indices = @transform_0, window_bounds = array<i64: 8, 32>}, {pipeline_mode = #tpu.pipeline_mode<synchronous>, transform_indices = @transform_1, window_bounds = array<i64: 32, 32>}, {pipeline_mode = #tpu.pipeline_mode<synchronous>, transform_indices = @transform_2, window_bounds = array<i64: 32, 32>}, {pipeline_mode = #tpu.pipeline_mode<synchronous>, transform_indices = @transform_3, window_bounds = array<i64: 32, 8>}, {pipeline_mode = #tpu.pipeline_mode<synchronous>, transform_indices = @transform_4, window_bounds = array<i64: 8, 128>}, {transform_indices = @transform_5, window_bounds = array<i64: 8, 8>}, {transform_indices = @transform_6, window_bounds = array<i64: 8, 32>}]} {
    %c0 = arith.constant 0 : index
    %c0_0 = arith.constant 0 : index
    %0 = vector.load %arg1[%c0, %c0_0] : memref<8x32xf32, #tpu.memory_space<vmem>>, vector<8x32xf32>
    %c0_1 = arith.constant 0 : index
    %c0_2 = arith.constant 0 : index
    %1 = vector.load %arg2[%c0_1, %c0_2] : memref<32x32xf32, #tpu.memory_space<vmem>>, vector<32x32xf32>
    %cst = arith.constant dense<0.000000e+00> : vector<8x32xf32>
    %2 = tpu.matmul %0, %1, %cst {dimension_numbers = #tpu.dot_dimension_numbers<[1], [0], [0], [1], [0, 0, 1, 1], [], []>} : vector<8x32xf32>, vector<32x32xf32>, vector<8x32xf32> -> vector<8x32xf32>
    %c0_3 = arith.constant 0 : index
    %c0_4 = arith.constant 0 : index
    %3 = vector.load %arg5[%c0_3, %c0_4] : memref<8x128xf32, #tpu.memory_space<vmem>>, vector<1x32xf32>
    %4 = vector.broadcast %3 : vector<1x32xf32> to vector<8x32xf32>
    %5 = arith.addf %2, %4 : vector<8x32xf32>
    %cst_5 = arith.constant 0.000000e+00 : f32
    %6 = vector.broadcast %cst_5 : f32 to vector<8x32xf32>
    %7 = arith.maximumf %5, %6 : vector<8x32xf32>
    %c0_6 = arith.constant 0 : index
    %c0_7 = arith.constant 0 : index
    %8 = vector.load %arg3[%c0_6, %c0_7] : memref<32x32xf32, #tpu.memory_space<vmem>>, vector<32x32xf32>
    %cst_8 = arith.constant dense<0.000000e+00> : vector<8x32xf32>
    %9 = tpu.matmul %7, %8, %cst_8 {dimension_numbers = #tpu.dot_dimension_numbers<[1], [0], [0], [1], [0, 0, 1, 1], [], []>} : vector<8x32xf32>, vector<32x32xf32>, vector<8x32xf32> -> vector<8x32xf32>
    %c1 = arith.constant 1 : index
    %c0_9 = arith.constant 0 : index
    %10 = vector.load %arg5[%c1, %c0_9] : memref<8x128xf32, #tpu.memory_space<vmem>>, vector<1x32xf32>
    %11 = vector.broadcast %10 : vector<1x32xf32> to vector<8x32xf32>
    %12 = arith.addf %9, %11 : vector<8x32xf32>
    %cst_10 = arith.constant 0.000000e+00 : f32
    %13 = vector.broadcast %cst_10 : f32 to vector<8x32xf32>
    %14 = arith.maximumf %12, %13 : vector<8x32xf32>
    %c2 = arith.constant 2 : index
    %c0_11 = arith.constant 0 : index
    %15 = vector.load %arg5[%c2, %c0_11] : memref<8x128xf32, #tpu.memory_space<vmem>>, vector<1x32xf32>
    %16 = vector.broadcast %15 : vector<1x32xf32> to vector<8x32xf32>
    %17 = arith.mulf %14, %16 : vector<8x32xf32>
    %c3 = arith.constant 3 : index
    %c0_12 = arith.constant 0 : index
    %18 = vector.load %arg5[%c3, %c0_12] : memref<8x128xf32, #tpu.memory_space<vmem>>, vector<1x32xf32>
    %19 = vector.broadcast %18 : vector<1x32xf32> to vector<8x32xf32>
    %20 = arith.addf %17, %19 : vector<8x32xf32>
    %c0_13 = arith.constant 0 : index
    %c0_14 = arith.constant 0 : index
    %21 = vector.load %arg4[%c0_13, %c0_14] : memref<32x8xf32, #tpu.memory_space<vmem>>, vector<32x8xf32>
    %cst_15 = arith.constant dense<0.000000e+00> : vector<8x8xf32>
    %22 = tpu.matmul %20, %21, %cst_15 {dimension_numbers = #tpu.dot_dimension_numbers<[1], [0], [0], [1], [0, 0, 1, 1], [], []>} : vector<8x32xf32>, vector<32x8xf32>, vector<8x8xf32> -> vector<8x8xf32>
    %c4 = arith.constant 4 : index
    %c0_16 = arith.constant 0 : index
    %23 = vector.load %arg5[%c4, %c0_16] : memref<8x128xf32, #tpu.memory_space<vmem>>, vector<1x8xf32>
    %24 = vector.broadcast %23 : vector<1x8xf32> to vector<8x8xf32>
    %25 = arith.addf %22, %24 : vector<8x8xf32>
    %c0_17 = arith.constant 0 : index
    %c0_18 = arith.constant 0 : index
    %26 = vector.load %arg6[%c0_17, %c0_18] : memref<8x8xf32, #tpu.memory_space<vmem>>, vector<8x8xf32>
    tpu.vector_store %arg6[%c0_17, %c0_18], %25 {strides = array<i32>} : memref<8x8xf32, #tpu.memory_space<vmem>>, vector<8x8xf32>,
    %c0_19 = arith.constant 0 : index
    %c0_20 = arith.constant 0 : index
    %27 = vector.load %arg7[%c0_19, %c0_20] : memref<8x32xf32, #tpu.memory_space<vmem>>, vector<8x32xf32>
    tpu.vector_store %arg7[%c0_19, %c0_20], %20 {strides = array<i32>} : memref<8x32xf32, #tpu.memory_space<vmem>>, vector<8x32xf32>,
    return
  }
  func.func @transform_0(%arg0: i32) -> (i32, i32) {
    %c0_i32 = arith.constant 0 : i32
    %c0_i32_0 = arith.constant 0 : i32
    return %arg0, %c0_i32 : i32, i32
  }
  func.func @transform_1(%arg0: i32) -> (i32, i32) {
    %c0_i32 = arith.constant 0 : i32
    %c0_i32_0 = arith.constant 0 : i32
    %c0_i32_1 = arith.constant 0 : i32
    return %c0_i32, %c0_i32_0 : i32, i32
  }
  func.func @transform_2(%arg0: i32) -> (i32, i32) {
    %c0_i32 = arith.constant 0 : i32
    %c0_i32_0 = arith.constant 0 : i32
    %c0_i32_1 = arith.constant 0 : i32
    return %c0_i32, %c0_i32_0 : i32, i32
  }
  func.func @transform_3(%arg0: i32) -> (i32, i32) {
    %c0_i32 = arith.constant 0 : i32
    %c0_i32_0 = arith.constant 0 : i32
    %c0_i32_1 = arith.constant 0 : i32
    return %c0_i32, %c0_i32_0 : i32, i32
  }
  func.func @transform_4(%arg0: i32) -> (i32, i32) {
    %c0_i32 = arith.constant 0 : i32
    %c0_i32_0 = arith.constant 0 : i32
    %c0_i32_1 = arith.constant 0 : i32
    return %c0_i32, %c0_i32_0 : i32, i32
  }
  func.func @transform_5(%arg0: i32) -> (i32, i32) {
    %c0_i32 = arith.constant 0 : i32
    %c0_i32_0 = arith.constant 0 : i32
    return %arg0, %c0_i32 : i32, i32
  }
  func.func @transform_6(%arg0: i32) -> (i32, i32) {
    %c0_i32 = arith.constant 0 : i32
    %c0_i32_0 = arith.constant 0 : i32
    return %arg0, %c0_i32 : i32, i32
  }
}

module attributes {stable_mosaic.version = 11 : i64} {
  func.func @_predictor_kernel(%arg0: i32, %arg1: memref<8x32xf32, #tpu.memory_space<vmem>>, %arg2: memref<32x32xf32, #tpu.memory_space<vmem>>, %arg3: memref<32x32xf32, #tpu.memory_space<vmem>>, %arg4: memref<32x8xf32, #tpu.memory_space<vmem>>, %arg5: memref<8x128xf32, #tpu.memory_space<vmem>>, %arg6: memref<8x8xf32, #tpu.memory_space<vmem>>, %arg7: memref<8x32xf32, #tpu.memory_space<vmem>>) attributes {dimension_semantics = [#tpu.dimension_semantics<parallel>], iteration_bounds = array<i64: 1>, scalar_prefetch = 0 : i64, scratch_operands = 0 : i64, tpu.core_type = #tpu.core_type<tc>, window_params = [{transform_indices = @transform_0, window_bounds = array<i64: 8, 32>}, {pipeline_mode = #tpu.pipeline_mode<synchronous>, transform_indices = @transform_1, window_bounds = array<i64: 32, 32>}, {pipeline_mode = #tpu.pipeline_mode<synchronous>, transform_indices = @transform_2, window_bounds = array<i64: 32, 32>}, {pipeline_mode = #tpu.pipeline_mode<synchronous>, transform_indices = @transform_3, window_bounds = array<i64: 32, 8>}, {pipeline_mode = #tpu.pipeline_mode<synchronous>, transform_indices = @transform_4, window_bounds = array<i64: 8, 128>}, {transform_indices = @transform_5, window_bounds = array<i64: 8, 8>}, {transform_indices = @transform_6, window_bounds = array<i64: 8, 32>}]} {
    %c0 = arith.constant 0 : index
    %c0_0 = arith.constant 0 : index
    %0 = vector.load %arg1[%c0, %c0_0] : memref<8x32xf32, #tpu.memory_space<vmem>>, vector<8x32xf32>
    %c0_1 = arith.constant 0 : index
    %c0_2 = arith.constant 0 : index
    %1 = vector.load %arg2[%c0_1, %c0_2] : memref<32x32xf32, #tpu.memory_space<vmem>>, vector<32x32xf32>
    %cst = arith.constant dense<0.000000e+00> : vector<8x32xf32>
    %2 = tpu.matmul %0, %1, %cst {dimension_numbers = #tpu.dot_dimension_numbers<[1], [0], [0], [1], [0, 0, 1, 1], [], []>} : vector<8x32xf32>, vector<32x32xf32>, vector<8x32xf32> -> vector<8x32xf32>
    %c0_3 = arith.constant 0 : index
    %c0_4 = arith.constant 0 : index
    %3 = vector.load %arg5[%c0_3, %c0_4] : memref<8x128xf32, #tpu.memory_space<vmem>>, vector<1x32xf32>
    %4 = vector.broadcast %3 : vector<1x32xf32> to vector<8x32xf32>
    %5 = arith.addf %2, %4 : vector<8x32xf32>
    %cst_5 = arith.constant 0.000000e+00 : f32
    %6 = vector.broadcast %cst_5 : f32 to vector<8x32xf32>
    %7 = arith.maximumf %5, %6 : vector<8x32xf32>
    %c0_6 = arith.constant 0 : index
    %c0_7 = arith.constant 0 : index
    %8 = vector.load %arg3[%c0_6, %c0_7] : memref<32x32xf32, #tpu.memory_space<vmem>>, vector<32x32xf32>
    %cst_8 = arith.constant dense<0.000000e+00> : vector<8x32xf32>
    %9 = tpu.matmul %7, %8, %cst_8 {dimension_numbers = #tpu.dot_dimension_numbers<[1], [0], [0], [1], [0, 0, 1, 1], [], []>} : vector<8x32xf32>, vector<32x32xf32>, vector<8x32xf32> -> vector<8x32xf32>
    %c1 = arith.constant 1 : index
    %c0_9 = arith.constant 0 : index
    %10 = vector.load %arg5[%c1, %c0_9] : memref<8x128xf32, #tpu.memory_space<vmem>>, vector<1x32xf32>
    %11 = vector.broadcast %10 : vector<1x32xf32> to vector<8x32xf32>
    %12 = arith.addf %9, %11 : vector<8x32xf32>
    %cst_10 = arith.constant 0.000000e+00 : f32
    %13 = vector.broadcast %cst_10 : f32 to vector<8x32xf32>
    %14 = arith.maximumf %12, %13 : vector<8x32xf32>
    %c2 = arith.constant 2 : index
    %c0_11 = arith.constant 0 : index
    %15 = vector.load %arg5[%c2, %c0_11] : memref<8x128xf32, #tpu.memory_space<vmem>>, vector<1x32xf32>
    %16 = vector.broadcast %15 : vector<1x32xf32> to vector<8x32xf32>
    %17 = arith.mulf %14, %16 : vector<8x32xf32>
    %c3 = arith.constant 3 : index
    %c0_12 = arith.constant 0 : index
    %18 = vector.load %arg5[%c3, %c0_12] : memref<8x128xf32, #tpu.memory_space<vmem>>, vector<1x32xf32>
    %19 = vector.broadcast %18 : vector<1x32xf32> to vector<8x32xf32>
    %20 = arith.addf %17, %19 : vector<8x32xf32>
    %c0_13 = arith.constant 0 : index
    %c0_14 = arith.constant 0 : index
    %21 = vector.load %arg4[%c0_13, %c0_14] : memref<32x8xf32, #tpu.memory_space<vmem>>, vector<32x8xf32>
    %cst_15 = arith.constant dense<0.000000e+00> : vector<8x8xf32>
    %22 = tpu.matmul %20, %21, %cst_15 {dimension_numbers = #tpu.dot_dimension_numbers<[1], [0], [0], [1], [0, 0, 1, 1], [], []>} : vector<8x32xf32>, vector<32x8xf32>, vector<8x8xf32> -> vector<8x8xf32>
    %c4 = arith.constant 4 : index
    %c0_16 = arith.constant 0 : index
    %23 = vector.load %arg5[%c4, %c0_16] : memref<8x128xf32, #tpu.memory_space<vmem>>, vector<1x8xf32>
    %24 = vector.broadcast %23 : vector<1x8xf32> to vector<8x8xf32>
    %25 = arith.addf %22, %24 : vector<8x8xf32>
    %c0_17 = arith.constant 0 : index
    %c0_18 = arith.constant 0 : index
    %26 = vector.load %arg6[%c0_17, %c0_18] : memref<8x8xf32, #tpu.memory_space<vmem>>, vector<8x8xf32>
    tpu.vector_store %arg6[%c0_17, %c0_18], %25 {strides = array<i32>} : memref<8x8xf32, #tpu.memory_space<vmem>>, vector<8x8xf32>,
    %c0_19 = arith.constant 0 : index
    %c0_20 = arith.constant 0 : index
    %27 = vector.load %arg7[%c0_19, %c0_20] : memref<8x32xf32, #tpu.memory_space<vmem>>, vector<8x32xf32>
    tpu.vector_store %arg7[%c0_19, %c0_20], %20 {strides = array<i32>} : memref<8x32xf32, #tpu.memory_space<vmem>>, vector<8x32xf32>,
    return
  }
  func.func @transform_0(%arg0: i32) -> (i32, i32) {
    %c0_i32 = arith.constant 0 : i32
    %c0_i32_0 = arith.constant 0 : i32
    return %arg0, %c0_i32 : i32, i32
  }
  func.func @transform_1(%arg0: i32) -> (i32, i32) {
    %c0_i32 = arith.constant 0 : i32
    %c0_i32_0 = arith.constant 0 : i32
    %c0_i32_1 = arith.constant 0 : i32
    return %c0_i32, %c0_i32_0 : i32, i32
  }
  func.func @transform_2(%arg0: i32) -> (i32, i32) {
    %c0_i32 = arith.constant 0 : i32
    %c0_i32_0 = arith.constant 0 : i32
    %c0_i32_1 = arith.constant 0 : i32
    return %c0_i32, %c0_i32_0 : i32, i32
  }
  func.func @transform_3(%arg0: i32) -> (i32, i32) {
    %c0_i32 = arith.constant 0 : i32
    %c0_i32_0 = arith.constant 0 : i32
    %c0_i32_1 = arith.constant 0 : i32
    return %c0_i32, %c0_i32_0 : i32, i32
  }
  func.func @transform_4(%arg0: i32) -> (i32, i32) {
    %c0_i32 = arith.constant 0 : i32
    %c0_i32_0 = arith.constant 0 : i32
    %c0_i32_1 = arith.constant 0 : i32
    return %c0_i32, %c0_i32_0 : i32, i32
  }
  func.func @transform_5(%arg0: i32) -> (i32, i32) {
    %c0_i32 = arith.constant 0 : i32
    %c0_i32_0 = arith.constant 0 : i32
    return %arg0, %c0_i32 : i32, i32
  }
  func.func @transform_6(%arg0: i32) -> (i32, i32) {
    %c0_i32 = arith.constant 0 : i32
    %c0_i32_0 = arith.constant 0 : i32
    return %arg0, %c0_i32 : i32, i32
  }
}

</mosaic_0001>

<bundles_post_ra>
// kernel: tpu_custom_call.1
= control target key start
LH: loop header
LB: loop body
LE: loop exit
PB: predicated region body
PF: predicated region fallthrough
CT: control target
= control target key end

     0   :  { %12 = vsyncpa [#allocation3], 0  ;;  %s614_s0 = inlined_call_operand.vmem [shape: f32[8,32], index: 0, kind: input, shape index: {}]   ;;  %s615_s1 = inlined_call_operand.vmem [shape: f32[32,32], index: 1, kind: input, shape index: {}]   ;;  %s616_s2 = inlined_call_operand.hbm [shape: f32[32,32], index: 2, kind: input, shape index: {}]   ;;  %s617_s3 = inlined_call_operand.vmem [shape: f32[32,8], index: 3, kind: input, shape index: {}]   ;;  %s618_s4 = inlined_call_operand.vmem [shape: f32[8,128], index: 4, kind: input, shape index: {}]   ;;  %s619_s5 = inlined_call_operand.hbm [shape: f32[8,8], index: 5, kind: output, shape index: {0}]   ;;  %s620_s6 = inlined_call_operand.hbm [shape: f32[8,32], index: 6, kind: output, shape index: {1}]  }
   0x1   :  { %13 = vsyncpa [#allocation4], 0 }
   0x2   :  { %14 = vsyncpa [#allocation7], 0  ;;  %s486_s21 = smov [#allocation2]   ;;  %s414_s25 = scalar_lea.hbm %s616_s2, 512 }
   0x3   :  { %s24_s22 = sshll.u32 %s486_s21, 4  ;;  %p415_p0 = scmp.ne.s32.totalorder %s616_s2, %s414_s25  ;;  %s25_s22 = int_to_ptr.vmem [resolvable:$true] %s24_s22 }
   0x4   :  { %p418_p1 = scmp.lt.u32.totalorder %s414_s25, %s616_s2 }
   0x6   :  { %p420_p2 = pnand %p418_p1, %p415_p0 }
   0x8   :  { %423 = shalt.err (!%p420_p2)
}
   0x9   :  { %s424_s30 = scalar_lea.vmem %s25_s22, 512  ;;  %p429_p4 = scmp.lt.s32.totalorder %s25_s22, %s25_s22 }
   0xa   :  { %p425_p3 = scmp.ne.s32.totalorder %s25_s22, %s424_s30  ;;  %p430_p5 = scmp.lt.s32.totalorder %s424_s30, %s424_s30 }
   0xc   :  { %p431_p6 = por %p430_p5, %p429_p4 }
   0xe   :  { %p432_p7 = pnand %p431_p6, %p425_p3 }
  0x10   :  { %435 = shalt.err (!%p432_p7)
}
  0x11   :  { %s487_s7 = smov 128   ;;  %s488_s8 = smov 8  }
  0x12   :  { %30 = dma.hbm_to_vmem [thread:$0]  %s616_s2, 512, %s25_s22, [#allocation3], %s487_s7, %s487_s7, %s488_s8  }
  0x13   :  { %480 = dma.done.wait [#allocation3], 512  }
  0x14   :  { %481 = vsyncadd [#allocation3], 4294966784  ;;  %v489_v0 = vmov 0.0|0.0   ;;  %vm490_vm0 = vmmov 0   ;;  %v491_v1 = vmov 0.0   ;;  %v39_v2 = vld [vmem:[%s615_s1] sm:$0xff] }
  0x15   :  { %388 = vmatprep.subr.bf16.mxu0 %v489_v0  ;;  %363 = vmatprep.mubr.msk.f32.mxu0 %vm490_vm0, %v491_v1  ;;  %v40_v3 = vld [vmem:[%s615_s1 + $0x8] sm:$0xff]  ;;  %v41_v4 = vld [vmem:[%s615_s1 + $0x10] sm:$0xff]  ;;  %v42_v6 = vld [vmem:[%s615_s1 + $0x18] sm:$0xff]  ;;  %vm48_vm1 = vcmask 261120  }
  0x16   :  { %394 = vmatprep.subr.bf16.mxu1 %v489_v0  ;;  %374 = vmatprep.mubr.msk.f32.mxu1 %vm490_vm0, %v491_v1  ;;  %v389_v5 = vpack.c.bf16 %v40_v3, %v39_v2  ;;  %v123_v7 = vld [vmem:[#allocation2] sm:$0xff]  ;;  %v124_v8 = vld [vmem:[#allocation2 + $0x8] sm:$0xff]  ;;  %v392_v9 = vpack.c.bf16 %v42_v6, %v41_v4  ;;  %v125_v12 = vld [vmem:[#allocation2 + $0x10] sm:$0xff] }
  0x17   :  { %v395_v10 = vpack.c.bf16 %v124_v8, %v123_v7  ;;  %v38_v11 = vld [vmem:[%s614_s0] sm:$0xff]  ;;  %v126_v13 = vld [vmem:[#allocation2 + $0x18] sm:$0xff]  ;;  %v219_v21 = vld [vmem:[%s617_s3 + $0x8] sm:$0xff] }
  0x18   :  { %390 = vmatpush3.bf16.msra.mxu0 %v389_v5  ;;  %v398_v14 = vpack.c.bf16 %v126_v13, %v125_v12  ;;  %v332_v15 = vld [vmem:[%s618_s4] ss:$0 sm:$0xff]  ;;  %v220_v23 = vld [vmem:[%s617_s3 + $0x10] sm:$0xff]  ;;  %v221_v24 = vld [vmem:[%s617_s3 + $0x18] sm:$0xff] }
  0x19   :  { %391 = vmatprep.subr.bf16.mxu0 %v489_v0  ;;  %396 = vmatpush3.bf16.msra.mxu1 %v395_v10  ;;  %v218_v20 = vld [vmem:[%s617_s3] sm:$0xff]  ;;  %v404_v25 = vpack.c.bf16 %v221_v24, %v220_v23  ;;  %s492_s3 = smov [#allocation6]  }
  0x1a   :  { %397 = vmatprep.subr.bf16.mxu1 %v489_v0  ;;  %v401_v22 = vpack.c.bf16 %v219_v21, %v218_v20  ;;  %v334_v26 = vld [vmem:[%s618_s4 + $0x1] ss:$0 sm:$0xff]  ;;  %v336_v30 = vld [vmem:[%s618_s4 + $0x2] ss:$0 sm:$0xff]  ;;  %v337_v32 = vld [vmem:[%s618_s4 + $0x3] ss:$0 sm:$0xff] }
  0x1b   :  { %s319_s10 = sshll.u32 %s492_s3, 4  ;;  %s320_s10 = int_to_ptr.vmem [resolvable:$true] %s319_s10 }
  0x1c   :  { %393 = vmatpush3.bf16.msra.mxu0 %v392_v9  ;;  %s436_s11 = scalar_lea.vmem %s320_s10, 128  ;;  %p441_p9 = scmp.lt.s32.totalorder %s320_s10, %s320_s10 }
  0x1d   :  { %400 = vmatprep.subr.bf16.mxu0 %v489_v0  ;;  %399 = vmatpush3.bf16.msra.mxu1 %v398_v14  ;;  %p437_p8 = scmp.ne.s32.totalorder %s320_s10, %s436_s11  ;;  %p442_p10 = scmp.lt.s32.totalorder %s436_s11, %s436_s11 }
  0x1f   :  { %364 = vmatmul.mubr.msk.f32.vlgmr.msra.gmra.mrb[0].mxu0 %vm48_vm1, %v38_v11  ;;  %p443_p11 = por %p442_p10, %p441_p9 }
  0x20   :  { %385 = vmatprep.mubr.msk.f32.mxu0 %vm490_vm0, %v491_v1  ;;  %402 = vmatpush3.bf16.msra.mxu0 %v401_v22 }
  0x21   :  { %403 = vmatprep.subr.bf16.mxu0 %v489_v0  ;;  %p444_p12 = pnand %p443_p11, %p437_p8 }
  0x24   :  { %405 = vmatpush3.bf16.msra.mxu0 %v404_v25 }
  0xf2   :  { %v118_v16 = vpop.f32.mrb[0].mxu0 }
  0xf3   :  { %v119_v17 = vadd.f32 %v332_v15, %v118_v16  ;;  %v365_v18 = vpop.f32.mrb[1].mxu0 }
  0xf5   :  { %v122_v19 = vmax.f32 %v119_v17, 0.0 }
  0xf7   :  { %375 = vmatmul.mubr.msk.f32.vlgmr.msra.gmra.mrb[0].mxu1 %vm48_vm1, %v122_v19 }
 0x1ca   :  { %v201_v27 = vpop.f32.mrb[0].mxu1 }
 0x1cb   :  { %v202_v28 = vadd.f32 %v334_v26, %v201_v27  ;;  %v376_v29 = vpop.f32.mrb[1].mxu1 }
 0x1cd   :  { %v205_v31 = vmax.f32 %v202_v28, 0.0 }
 0x1cf   :  { %v211_v33 = vmul.f32 %v336_v30, %v205_v31 }
 0x1d1   :  { %v217_v34 = vadd.f32 %v337_v32, %v211_v33 }
 0x1d3   :  { %302 = vst.msk [vmem:[#allocation6] sm:$0xff] %vm48_vm1, %v217_v34  ;;  %386 = vmatmul.mubr.msk.f32.vlgmr.msra.gmra.mrb[2].mxu0 %vm48_vm1, %v217_v34 }
 0x1d4   :  { %447 = shalt.err (!%p444_p12)
}
 0x1d5   :  { %s448_s14 = scalar_lea.hbm %s620_s6, 128 }
 0x1d6   :  { %p449_p13 = scmp.ne.s32.totalorder %s620_s6, %s448_s14  ;;  %p452_p0 = scmp.lt.u32.totalorder %s448_s14, %s620_s6 }
 0x1d8   :  { %p454_p1 = pnand %p452_p0, %p449_p13 }
 0x1da   :  { %457 = shalt.err (!%p454_p1)
}
 0x1db   :  { %322 = dma.vmem_to_hbm [thread:$0]  %s320_s10, 128, %s620_s6, [#allocation7]   ;;  %v338_v35 = vld [vmem:[%s618_s4 + $0x4] ss:$0 sm:$0xff]  ;;  %vm300_vm2 = vcmask 64512  }
 0x1dc   :  { %s493_s0 = smov [#allocation5]  }
 0x1dd   :  { %s309_s21 = sshll.u32 %s493_s0, 4  ;;  %s310_s21 = int_to_ptr.vmem [resolvable:$true] %s309_s21 }
 0x1de   :  { %s458_s22 = scalar_lea.vmem %s310_s21, 128  ;;  %p463_p3 = scmp.lt.s32.totalorder %s310_s21, %s310_s21 }
 0x1df   :  { %p459_p2 = scmp.ne.s32.totalorder %s310_s21, %s458_s22  ;;  %p464_p4 = scmp.lt.s32.totalorder %s458_s22, %s458_s22 }
 0x1e1   :  { %p465_p5 = por %p464_p4, %p463_p3 }
 0x1e3   :  { %p466_p6 = pnand %p465_p5, %p459_p2 }
 0x2a6   :  { %v296_v36 = vpop.f32.mrb[2].mxu0 }
 0x2a7   :  { %v297_v37 = vadd.f32 %v338_v35, %v296_v36  ;;  %v387_v38 = vpop.f32.mrb[3].mxu0 }
 0x2a9   :  { %301 = vst.msk [vmem:[#allocation5] sm:$0xff] %vm300_vm2, %v297_v37 }
 0x2aa   :  { %469 = shalt.err (!%p466_p6)
}
 0x2ab   :  { %s470_s24 = scalar_lea.hbm %s619_s5, 128 }
 0x2ac   :  { %p471_p7 = scmp.ne.s32.totalorder %s619_s5, %s470_s24  ;;  %p474_p8 = scmp.lt.u32.totalorder %s470_s24, %s619_s5 }
 0x2ae   :  { %p476_p9 = pnand %p474_p8, %p471_p7 }
 0x2b0   :  { %479 = shalt.err (!%p476_p9)
}
 0x2b1   :  { %312 = dma.vmem_to_hbm [thread:$0]  %s310_s21, 128, %s619_s5, [#allocation4]  }
 0x2b2   :  { %482 = dma.done.wait [#allocation4], 128  }
 0x2b3   :  { %483 = vsyncadd [#allocation4], 4294967168 }
 0x2b4   :  { %484 = dma.done.wait [#allocation7], 128  }
 0x2b5   :  { %485 = vsyncadd [#allocation7], 4294967168 }
 0x2b6   :  { %329 = vsyncpa [#allocation3], 1 }
 0x2b7   :  { %330 = vsyncpa [#allocation4], 1 }
 0x2b8   :  { %331 = vsyncpa [#allocation7], 1 }

// kernel: tpu_custom_call.1
= control target key start
LH: loop header
LB: loop body
LE: loop exit
PB: predicated region body
PF: predicated region fallthrough
CT: control target
= control target key end

     0   :  { %12 = vsyncpa [#allocation3], 0  ;;  %s614_s0 = inlined_call_operand.vmem [shape: f32[8,32], index: 0, kind: input, shape index: {}]   ;;  %s615_s1 = inlined_call_operand.vmem [shape: f32[32,32], index: 1, kind: input, shape index: {}]   ;;  %s616_s2 = inlined_call_operand.hbm [shape: f32[32,32], index: 2, kind: input, shape index: {}]   ;;  %s617_s3 = inlined_call_operand.vmem [shape: f32[32,8], index: 3, kind: input, shape index: {}]   ;;  %s618_s4 = inlined_call_operand.vmem [shape: f32[8,128], index: 4, kind: input, shape index: {}]   ;;  %s619_s5 = inlined_call_operand.hbm [shape: f32[8,8], index: 5, kind: output, shape index: {0}]   ;;  %s620_s6 = inlined_call_operand.hbm [shape: f32[8,32], index: 6, kind: output, shape index: {1}]  }
   0x1   :  { %13 = vsyncpa [#allocation4], 0 }
   0x2   :  { %14 = vsyncpa [#allocation7], 0  ;;  %s486_s21 = smov [#allocation2]   ;;  %s414_s25 = scalar_lea.hbm %s616_s2, 512 }
   0x3   :  { %s24_s22 = sshll.u32 %s486_s21, 4  ;;  %p415_p0 = scmp.ne.s32.totalorder %s616_s2, %s414_s25  ;;  %s25_s22 = int_to_ptr.vmem [resolvable:$true] %s24_s22 }
   0x4   :  { %p418_p1 = scmp.lt.u32.totalorder %s414_s25, %s616_s2 }
   0x6   :  { %p420_p2 = pnand %p418_p1, %p415_p0 }
   0x8   :  { %423 = shalt.err (!%p420_p2)
}
   0x9   :  { %s424_s30 = scalar_lea.vmem %s25_s22, 512  ;;  %p429_p4 = scmp.lt.s32.totalorder %s25_s22, %s25_s22 }
   0xa   :  { %p425_p3 = scmp.ne.s32.totalorder %s25_s22, %s424_s30  ;;  %p430_p5 = scmp.lt.s32.totalorder %s424_s30, %s424_s30 }
   0xc   :  { %p431_p6 = por %p430_p5, %p429_p4 }
   0xe   :  { %p432_p7 = pnand %p431_p6, %p425_p3 }
  0x10   :  { %435 = shalt.err (!%p432_p7)
}
  0x11   :  { %s487_s7 = smov 128   ;;  %s488_s8 = smov 8  }
  0x12   :  { %30 = dma.hbm_to_vmem [thread:$0]  %s616_s2, 512, %s25_s22, [#allocation3], %s487_s7, %s487_s7, %s488_s8  }
  0x13   :  { %480 = dma.done.wait [#allocation3], 512  }
  0x14   :  { %481 = vsyncadd [#allocation3], 4294966784  ;;  %v489_v0 = vmov 0.0|0.0   ;;  %vm490_vm0 = vmmov 0   ;;  %v491_v1 = vmov 0.0   ;;  %v39_v2 = vld [vmem:[%s615_s1] sm:$0xff] }
  0x15   :  { %388 = vmatprep.subr.bf16.mxu0 %v489_v0  ;;  %363 = vmatprep.mubr.msk.f32.mxu0 %vm490_vm0, %v491_v1  ;;  %v40_v3 = vld [vmem:[%s615_s1 + $0x8] sm:$0xff]  ;;  %v41_v4 = vld [vmem:[%s615_s1 + $0x10] sm:$0xff]  ;;  %v42_v6 = vld [vmem:[%s615_s1 + $0x18] sm:$0xff]  ;;  %vm48_vm1 = vcmask 261120  }
  0x16   :  { %394 = vmatprep.subr.bf16.mxu1 %v489_v0  ;;  %374 = vmatprep.mubr.msk.f32.mxu1 %vm490_vm0, %v491_v1  ;;  %v389_v5 = vpack.c.bf16 %v40_v3, %v39_v2  ;;  %v123_v7 = vld [vmem:[#allocation2] sm:$0xff]  ;;  %v124_v8 = vld [vmem:[#allocation2 + $0x8] sm:$0xff]  ;;  %v392_v9 = vpack.c.bf16 %v42_v6, %v41_v4  ;;  %v125_v12 = vld [vmem:[#allocation2 + $0x10] sm:$0xff] }
  0x17   :  { %v395_v10 = vpack.c.bf16 %v124_v8, %v123_v7  ;;  %v38_v11 = vld [vmem:[%s614_s0] sm:$0xff]  ;;  %v126_v13 = vld [vmem:[#allocation2 + $0x18] sm:$0xff]  ;;  %v219_v21 = vld [vmem:[%s617_s3 + $0x8] sm:$0xff] }
  0x18   :  { %390 = vmatpush3.bf16.msra.mxu0 %v389_v5  ;;  %v398_v14 = vpack.c.bf16 %v126_v13, %v125_v12  ;;  %v332_v15 = vld [vmem:[%s618_s4] ss:$0 sm:$0xff]  ;;  %v220_v23 = vld [vmem:[%s617_s3 + $0x10] sm:$0xff]  ;;  %v221_v24 = vld [vmem:[%s617_s3 + $0x18] sm:$0xff] }
  0x19   :  { %391 = vmatprep.subr.bf16.mxu0 %v489_v0  ;;  %396 = vmatpush3.bf16.msra.mxu1 %v395_v10  ;;  %v218_v20 = vld [vmem:[%s617_s3] sm:$0xff]  ;;  %v404_v25 = vpack.c.bf16 %v221_v24, %v220_v23  ;;  %s492_s3 = smov [#allocation6]  }
  0x1a   :  { %397 = vmatprep.subr.bf16.mxu1 %v489_v0  ;;  %v401_v22 = vpack.c.bf16 %v219_v21, %v218_v20  ;;  %v334_v26 = vld [vmem:[%s618_s4 + $0x1] ss:$0 sm:$0xff]  ;;  %v336_v30 = vld [vmem:[%s618_s4 + $0x2] ss:$0 sm:$0xff]  ;;  %v337_v32 = vld [vmem:[%s618_s4 + $0x3] ss:$0 sm:$0xff] }
  0x1b   :  { %s319_s10 = sshll.u32 %s492_s3, 4  ;;  %s320_s10 = int_to_ptr.vmem [resolvable:$true] %s319_s10 }
  0x1c   :  { %393 = vmatpush3.bf16.msra.mxu0 %v392_v9  ;;  %s436_s11 = scalar_lea.vmem %s320_s10, 128  ;;  %p441_p9 = scmp.lt.s32.totalorder %s320_s10, %s320_s10 }
  0x1d   :  { %400 = vmatprep.subr.bf16.mxu0 %v489_v0  ;;  %399 = vmatpush3.bf16.msra.mxu1 %v398_v14  ;;  %p437_p8 = scmp.ne.s32.totalorder %s320_s10, %s436_s11  ;;  %p442_p10 = scmp.lt.s32.totalorder %s436_s11, %s436_s11 }
  0x1f   :  { %364 = vmatmul.mubr.msk.f32.vlgmr.msra.gmra.mrb[0].mxu0 %vm48_vm1, %v38_v11  ;;  %p443_p11 = por %p442_p10, %p441_p9 }
  0x20   :  { %385 = vmatprep.mubr.msk.f32.mxu0 %vm490_vm0, %v491_v1  ;;  %402 = vmatpush3.bf16.msra.mxu0 %v401_v22 }
  0x21   :  { %403 = vmatprep.subr.bf16.mxu0 %v489_v0  ;;  %p444_p12 = pnand %p443_p11, %p437_p8 }
  0x24   :  { %405 = vmatpush3.bf16.msra.mxu0 %v404_v25 }
  0xf2   :  { %v118_v16 = vpop.f32.mrb[0].mxu0 }
  0xf3   :  { %v119_v17 = vadd.f32 %v332_v15, %v118_v16  ;;  %v365_v18 = vpop.f32.mrb[1].mxu0 }
  0xf5   :  { %v122_v19 = vmax.f32 %v119_v17, 0.0 }
  0xf7   :  { %375 = vmatmul.mubr.msk.f32.vlgmr.msra.gmra.mrb[0].mxu1 %vm48_vm1, %v122_v19 }
 0x1ca   :  { %v201_v27 = vpop.f32.mrb[0].mxu1 }
 0x1cb   :  { %v202_v28 = vadd.f32 %v334_v26, %v201_v27  ;;  %v376_v29 = vpop.f32.mrb[1].mxu1 }
 0x1cd   :  { %v205_v31 = vmax.f32 %v202_v28, 0.0 }
 0x1cf   :  { %v211_v33 = vmul.f32 %v336_v30, %v205_v31 }
 0x1d1   :  { %v217_v34 = vadd.f32 %v337_v32, %v211_v33 }
 0x1d3   :  { %302 = vst.msk [vmem:[#allocation6] sm:$0xff] %vm48_vm1, %v217_v34  ;;  %386 = vmatmul.mubr.msk.f32.vlgmr.msra.gmra.mrb[2].mxu0 %vm48_vm1, %v217_v34 }
 0x1d4   :  { %447 = shalt.err (!%p444_p12)
}
 0x1d5   :  { %s448_s14 = scalar_lea.hbm %s620_s6, 128 }
 0x1d6   :  { %p449_p13 = scmp.ne.s32.totalorder %s620_s6, %s448_s14  ;;  %p452_p0 = scmp.lt.u32.totalorder %s448_s14, %s620_s6 }
 0x1d8   :  { %p454_p1 = pnand %p452_p0, %p449_p13 }
 0x1da   :  { %457 = shalt.err (!%p454_p1)
}
 0x1db   :  { %322 = dma.vmem_to_hbm [thread:$0]  %s320_s10, 128, %s620_s6, [#allocation7]   ;;  %v338_v35 = vld [vmem:[%s618_s4 + $0x4] ss:$0 sm:$0xff]  ;;  %vm300_vm2 = vcmask 64512  }
 0x1dc   :  { %s493_s0 = smov [#allocation5]  }
 0x1dd   :  { %s309_s21 = sshll.u32 %s493_s0, 4  ;;  %s310_s21 = int_to_ptr.vmem [resolvable:$true] %s309_s21 }
 0x1de   :  { %s458_s22 = scalar_lea.vmem %s310_s21, 128  ;;  %p463_p3 = scmp.lt.s32.totalorder %s310_s21, %s310_s21 }
 0x1df   :  { %p459_p2 = scmp.ne.s32.totalorder %s310_s21, %s458_s22  ;;  %p464_p4 = scmp.lt.s32.totalorder %s458_s22, %s458_s22 }
 0x1e1   :  { %p465_p5 = por %p464_p4, %p463_p3 }
 0x1e3   :  { %p466_p6 = pnand %p465_p5, %p459_p2 }
 0x2a6   :  { %v296_v36 = vpop.f32.mrb[2].mxu0 }
 0x2a7   :  { %v297_v37 = vadd.f32 %v338_v35, %v296_v36  ;;  %v387_v38 = vpop.f32.mrb[3].mxu0 }
 0x2a9   :  { %301 = vst.msk [vmem:[#allocation5] sm:$0xff] %vm300_vm2, %v297_v37 }
 0x2aa   :  { %469 = shalt.err (!%p466_p6)
}
 0x2ab   :  { %s470_s24 = scalar_lea.hbm %s619_s5, 128 }
 0x2ac   :  { %p471_p7 = scmp.ne.s32.totalorder %s619_s5, %s470_s24  ;;  %p474_p8 = scmp.lt.u32.totalorder %s470_s24, %s619_s5 }
 0x2ae   :  { %p476_p9 = pnand %p474_p8, %p471_p7 }
 0x2b0   :  { %479 = shalt.err (!%p476_p9)
}
 0x2b1   :  { %312 = dma.vmem_to_hbm [thread:$0]  %s310_s21, 128, %s619_s5, [#allocation4]  }
 0x2b2   :  { %482 = dma.done.wait [#allocation4], 128  }
 0x2b3   :  { %483 = vsyncadd [#allocation4], 4294967168 }
 0x2b4   :  { %484 = dma.done.wait [#allocation7], 128  }
 0x2b5   :  { %485 = vsyncadd [#allocation7], 4294967168 }
 0x2b6   :  { %329 = vsyncpa [#allocation3], 1 }
 0x2b7   :  { %330 = vsyncpa [#allocation4], 1 }
 0x2b8   :  { %331 = vsyncpa [#allocation7], 1 }

</bundles_post_ra>
